<compile_context>
chip_gen: v6e
topology: v6e:2x2x1
jax: 0.10.0
libtpu: 0.0.40
codegen_flags: <defaults>
</compile_context>

<pallas_src>
import functools

import jax
import jax.numpy as jnp
from jax.experimental import pallas as pl
from jax.experimental.pallas import tpu as pltpu

LN_EPS = 1e-5
MIN_LOG_STD = -20.0
MAX_LOG_STD = 2.0


def _layernorm(x, gamma, beta, eps=LN_EPS):
    # One-pass: var = E[x^2] - mean^2 (biased, like torch.nn.LayerNorm), clamped
    # at 0 to guard against f32 cancellation going slightly negative.
    mu = jnp.mean(x, axis=-1, keepdims=True)
    mu2 = jnp.mean(x * x, axis=-1, keepdims=True)
    var = jnp.maximum(mu2 - mu * mu, 0.0)
    return (x - mu) * jax.lax.rsqrt(var + eps) * gamma + beta


def policy_kernel(
    x_ref,
    w1_ref, b1_ref, g1_ref, be1_ref,
    w2_ref, b2_ref, g2_ref, be2_ref,
    wh_ref, bh_ref, gh_ref, beh_ref,
    out_ref,
    *, p_size, half,
):
    mxu_dtype = w1_ref.dtype          # bf16 by default, f32 if requested
    x = x_ref[...]                    # [tb, P] float32

    # ---- base layer 1: Linear -> LayerNorm -> ReLU ----
    h = jnp.dot(x.astype(mxu_dtype), w1_ref[...],
                preferred_element_type=jnp.float32) + b1_ref[...]
    h = _layernorm(h, g1_ref[...], be1_ref[...])
    h = jnp.maximum(h, 0.0)

    # ---- base layer 2: Linear -> LayerNorm -> ReLU ----
    h = jnp.dot(h.astype(mxu_dtype), w2_ref[...],
                preferred_element_type=jnp.float32) + b2_ref[...]
    h = _layernorm(h, g2_ref[...], be2_ref[...])
    h = jnp.maximum(h, 0.0)

    # ---- fused, lane-padded heads: one [H, L] matmul (L = 2*half >= 128) ----
    # mean head occupies lanes [0, p_size), std head lanes [half, half+p_size);
    # padded lanes carry zero weights/biases so they stay exactly 0 in `ms`.
    ms = jnp.dot(h.astype(mxu_dtype), wh_ref[...],
                 preferred_element_type=jnp.float32) + bh_ref[...]   # [tb, L] f32

    L = out_ref.shape[-1]
    lane = jax.lax.broadcasted_iota(jnp.int32, (1, L), 1)
    is_mean = lane < half

    # Per-half LayerNorm statistics via masked full-width reductions (padded
    # lanes are zero, so dividing by p_size gives the exact per-head mean/var).
    inv_p = 1.0 / p_size
    ms_m = jnp.where(is_mean, ms, 0.0)
    ms_s = ms - ms_m
    mu_m = jnp.sum(ms_m, axis=-1, keepdims=True) * inv_p
    mu_s = jnp.sum(ms_s, axis=-1, keepdims=True) * inv_p
    m2_m = jnp.sum(ms_m * ms_m, axis=-1, keepdims=True) * inv_p
    m2_s = jnp.sum(ms_s * ms_s, axis=-1, keepdims=True) * inv_p
    var_m = jnp.maximum(m2_m - mu_m * mu_m, 0.0)
    var_s = jnp.maximum(m2_s - mu_s * mu_s, 0.0)

    mu = jnp.where(is_mean, mu_m, mu_s)
    rs = jnp.where(is_mean,
                   jax.lax.rsqrt(var_m + LN_EPS),
                   jax.lax.rsqrt(var_s + LN_EPS))

    y = (ms - mu) * rs * gh_ref[...] + beh_ref[...]        # both LayerNorms

    # std half: clamp -> exp -> clamp (computed full-width on the VPU/EUP,
    # selected by lane so the single store stays unmasked and lane-dense).
    log_std = jnp.clip(y, MIN_LOG_STD, MAX_LOG_STD)
    std = jnp.clip(jnp.exp(log_std), 1e-3, 100.0)

    out_ref[...] = jnp.where(is_mean, y, std).astype(out_ref.dtype)


def prepare_params(raw, mxu_dtype=jnp.bfloat16):
    """One-time param preparation (hoisted out of the per-call jit path).

    Fuses + lane-pads the two heads into [H, L] / [1, L] slabs (L = 2*half,
    half = round_up(P, 64), so L is a multiple of 128) and casts the matmul
    weights to `mxu_dtype` (f32 accumulation happens in-kernel).
    """
    P, H = raw["w1"].shape
    half = ((P + 63) // 64) * 64
    L = 2 * half

    def pad_head(m_arr, s_arr):
        rows = m_arr.shape[0]
        out = jnp.zeros((rows, L), jnp.float32)
        out = out.at[:, :P].set(m_arr)
        out = out.at[:, half:half + P].set(s_arr)
        return out

    return dict(
        w1=raw["w1"].astype(mxu_dtype), b1=raw["b1"], g1=raw["g1"], be1=raw["be1"],
        w2=raw["w2"].astype(mxu_dtype), b2=raw["b2"], g2=raw["g2"], be2=raw["be2"],
        wh=pad_head(raw["wm"], raw["ws"]).astype(mxu_dtype),
        bh=pad_head(raw["bm"], raw["bs"]),
        gh=pad_head(raw["gm"], raw["gs"]),
        beh=pad_head(raw["bem"], raw["bes"]),
    )


@functools.partial(jax.jit, static_argnames=("tb",))
def policy_forward(x, params, tb=None):
    """x: [B, P] float32. params: output of prepare_params().

    Returns (mean, std), each [B, P] float32.
    """
    B, P = x.shape
    H = params["w1"].shape[1]
    L = params["wh"].shape[1]
    half = L // 2

    # Batch tile: whole (8-rounded) batch for small B; split into >= 2
    # "parallel" grid steps for large batches so v7x's 2 TensorCores both work.
    if tb is None:
        b8 = ((B + 7) // 8) * 8
        if b8 >= 512:
            tb = min(1024, (((b8 + 1) // 2 + 7) // 8) * 8)
        else:
            tb = b8
    assert tb % 8 == 0, "batch tile must be a multiple of 8 (sublane)"
    Bp = ((B + tb - 1) // tb) * tb
    if Bp != B:
        x = jnp.pad(x, ((0, Bp - B), (0, 0)))
    grid = (Bp // tb,)

    def full2d(shape):
        # whole-array block, invariant across the batch grid
        return pl.BlockSpec(shape, lambda i: (0, 0))

    in_specs = [
        pl.BlockSpec((tb, P), lambda i: (i, 0)),                            # x tile
        full2d((P, H)), full2d((1, H)), full2d((1, H)), full2d((1, H)),     # layer 1
        full2d((H, H)), full2d((1, H)), full2d((1, H)), full2d((1, H)),     # layer 2
        full2d((H, L)), full2d((1, L)),                                     # fused heads W, b
        full2d((1, L)), full2d((1, L)),                                     # fused heads gamma, beta
    ]
    out_specs = pl.BlockSpec((tb, L), lambda i: (i, 0))

    itemsize = jnp.dtype(params["w1"].dtype).itemsize
    n_weight_elems = P * H + H * H + H * L
    cost = pl.CostEstimate(
        flops=2 * Bp * n_weight_elems,
        transcendentals=Bp * (L + 4),                 # exp on the head slab + rsqrt per LN row
        bytes_accessed=(n_weight_elems * itemsize     # matmul weights
                        + (6 * H + 3 * L) * 4         # biases / gamma / beta (f32)
                        + Bp * P * 4 + Bp * L * 4),   # x in, [mean|std] slab out
    )

    kernel = functools.partial(policy_kernel, p_size=P, half=half)

    out = pl.pallas_call(
        kernel,
        out_shape=jax.ShapeDtypeStruct((Bp, L), jnp.float32),
        grid_spec=pltpu.PrefetchScalarGridSpec(
            num_scalar_prefetch=0,
            grid=grid,
            in_specs=in_specs,
            out_specs=out_specs,
        ),
        compiler_params=pltpu.CompilerParams(
            dimension_semantics=("parallel",),
        ),
        cost_estimate=cost,
    )(
        x,
        params["w1"], params["b1"], params["g1"], params["be1"],
        params["w2"], params["b2"], params["g2"], params["be2"],
        params["wh"], params["bh"], params["gh"], params["beh"],
    )

    mean = out[:B, :P]
    std = out[:B, half:half + P]
    return mean, std


def make_params(key, p_size):
    """Deterministic synthetic parameters (PyTorch-like uniform init), pre-transposed to [in, out]."""
    H = 4 * p_size
    ks = jax.random.split(key, 8)

    def lin(k, fan_in, fan_out):
        kw, kb = jax.random.split(k)
        bound = 1.0 / jnp.sqrt(fan_in)
        w = jax.random.uniform(kw, (fan_in, fan_out), jnp.float32, -bound, bound)
        b = jax.random.uniform(kb, (1, fan_out), jnp.float32, -bound, bound)
        return w, b

    w1, b1 = lin(ks[0], p_size, H)
    w2, b2 = lin(ks[1], H, H)
    wm, bm = lin(ks[2], H, p_size)
    ws, bs = lin(ks[3], H, p_size)

    ones = lambda n: jnp.ones((1, n), jnp.float32)
    zeros = lambda n: jnp.zeros((1, n), jnp.float32)

    return dict(
        w1=w1, b1=b1, g1=ones(H), be1=zeros(H),
        w2=w2, b2=b2, g2=ones(H), be2=zeros(H),
        wm=wm, bm=bm, gm=ones(p_size), bem=zeros(p_size),
        ws=ws, bs=bs, gs=ones(p_size), bes=zeros(p_size),
    )


def reference_forward(x, p):
    """Pure-JAX reference mirroring the PyTorch module."""
    def ln(v, g, b):
        mu = jnp.mean(v, -1, keepdims=True)
        var = jnp.mean((v - mu) ** 2, -1, keepdims=True)
        return (v - mu) / jnp.sqrt(var + LN_EPS) * g + b

    h = jnp.maximum(ln(x @ p["w1"] + p["b1"], p["g1"], p["be1"]), 0.0)
    h = jnp.maximum(ln(h @ p["w2"] + p["b2"], p["g2"], p["be2"]), 0.0)
    mean = ln(h @ p["wm"] + p["bm"], p["gm"], p["bem"])
    log_std = ln(h @ p["ws"] + p["bs"], p["gs"], p["bes"])
    log_std = jnp.clip(log_std, MIN_LOG_STD, MAX_LOG_STD)
    std = jnp.clip(jnp.exp(log_std), 1e-3, 100.0)
    return mean, std


if __name__ == "__main__":
    P_SIZE = 32          # cfg.env.p_size
    BATCH = 16

    key = jax.random.PRNGKey(0)
    kx, kp = jax.random.split(key)
    x = jax.random.normal(kx, (BATCH, P_SIZE), jnp.float32)
    raw = make_params(kp, P_SIZE)
    ref_mean, ref_std = reference_forward(x, raw)

    # --- f32-on-MXU path (tight tolerance) ---
    params_f32 = prepare_params(raw, mxu_dtype=jnp.float32)
    mean, std = policy_forward(x, params_f32)
    jax.block_until_ready((mean, std))
    assert mean.shape == (BATCH, P_SIZE) and std.shape == (BATCH, P_SIZE)
    assert jnp.allclose(mean, ref_mean, atol=1e-4, rtol=1e-4), "mean mismatch (f32)"
    assert jnp.allclose(std, ref_std, atol=1e-4, rtol=1e-4), "std mismatch (f32)"

    # --- ragged batch (exercises the zero-pad + slice-back path) ---
    x_odd = x[:13]
    mean_o, std_o = policy_forward(x_odd, params_f32)
    jax.block_until_ready((mean_o, std_o))
    ref_mean_o, ref_std_o = reference_forward(x_odd, raw)
    assert jnp.allclose(mean_o, ref_mean_o, atol=1e-4, rtol=1e-4), "mean mismatch (ragged)"
    assert jnp.allclose(std_o, ref_std_o, atol=1e-4, rtol=1e-4), "std mismatch (ragged)"

    # --- default bf16-on-MXU path (f32 accumulation + f32 LN), looser tolerance ---
    params_bf = prepare_params(raw)   # mxu_dtype defaults to bfloat16
    mean_bf, std_bf = policy_forward(x, params_bf)
    jax.block_until_ready((mean_bf, std_bf))
    assert jnp.all(jnp.isfinite(mean_bf)) and jnp.all(jnp.isfinite(std_bf))
    assert jnp.allclose(mean_bf, ref_mean, atol=0.25, rtol=0.25), "mean mismatch (bf16)"
    assert jnp.allclose(std_bf, ref_std, atol=0.25, rtol=0.25), "std mismatch (bf16)"

    print("KERNEL_OK")
</pallas_src>

<mosaic_0001>
module attributes {stable_mosaic.version = 11 : i64} {
  func.func @policy_kernel(%arg0: i32, %arg1: memref<16x32xf32, #tpu.memory_space<vmem>>, %arg2: memref<32x128xf32, #tpu.memory_space<vmem>>, %arg3: memref<1x128xf32, #tpu.memory_space<vmem>>, %arg4: memref<1x128xf32, #tpu.memory_space<vmem>>, %arg5: memref<1x128xf32, #tpu.memory_space<vmem>>, %arg6: memref<128x128xf32, #tpu.memory_space<vmem>>, %arg7: memref<1x128xf32, #tpu.memory_space<vmem>>, %arg8: memref<1x128xf32, #tpu.memory_space<vmem>>, %arg9: memref<1x128xf32, #tpu.memory_space<vmem>>, %arg10: memref<128x128xf32, #tpu.memory_space<vmem>>, %arg11: memref<1x128xf32, #tpu.memory_space<vmem>>, %arg12: memref<1x128xf32, #tpu.memory_space<vmem>>, %arg13: memref<1x128xf32, #tpu.memory_space<vmem>>, %arg14: memref<16x128xf32, #tpu.memory_space<vmem>>) attributes {dimension_semantics = [#tpu.dimension_semantics<parallel>], iteration_bounds = array<i64: 1>, scalar_prefetch = 0 : i64, scratch_operands = 0 : i64, tpu.core_type = #tpu.core_type<tc>, window_params = [{transform_indices = @transform_0, window_bounds = array<i64: 16, 32>}, {pipeline_mode = #tpu.pipeline_mode<synchronous>, transform_indices = @transform_1, window_bounds = array<i64: 32, 128>}, {pipeline_mode = #tpu.pipeline_mode<synchronous>, transform_indices = @transform_2, window_bounds = array<i64: 1, 128>}, {pipeline_mode = #tpu.pipeline_mode<synchronous>, transform_indices = @transform_3, window_bounds = array<i64: 1, 128>}, {pipeline_mode = #tpu.pipeline_mode<synchronous>, transform_indices = @transform_4, window_bounds = array<i64: 1, 128>}, {pipeline_mode = #tpu.pipeline_mode<synchronous>, transform_indices = @transform_5, window_bounds = array<i64: 128, 128>}, {pipeline_mode = #tpu.pipeline_mode<synchronous>, transform_indices = @transform_6, window_bounds = array<i64: 1, 128>}, {pipeline_mode = #tpu.pipeline_mode<synchronous>, transform_indices = @transform_7, window_bounds = array<i64: 1, 128>}, {pipeline_mode = #tpu.pipeline_mode<synchronous>, transform_indices = @transform_8, window_bounds = array<i64: 1, 128>}, {pipeline_mode = #tpu.pipeline_mode<synchronous>, transform_indices = @transform_9, window_bounds = array<i64: 128, 128>}, {pipeline_mode = #tpu.pipeline_mode<synchronous>, transform_indices = @transform_10, window_bounds = array<i64: 1, 128>}, {pipeline_mode = #tpu.pipeline_mode<synchronous>, transform_indices = @transform_11, window_bounds = array<i64: 1, 128>}, {pipeline_mode = #tpu.pipeline_mode<synchronous>, transform_indices = @transform_12, window_bounds = array<i64: 1, 128>}, {transform_indices = @transform_13, window_bounds = array<i64: 16, 128>}]} {
    %c0 = arith.constant 0 : index
    %c0_0 = arith.constant 0 : index
    %0 = vector.load %arg1[%c0, %c0_0] : memref<16x32xf32, #tpu.memory_space<vmem>>, vector<16x32xf32>
    %c0_1 = arith.constant 0 : index
    %c0_2 = arith.constant 0 : index
    %1 = vector.load %arg2[%c0_1, %c0_2] : memref<32x128xf32, #tpu.memory_space<vmem>>, vector<32x128xf32>
    %cst = arith.constant dense<0.000000e+00> : vector<16x128xf32>
    %2 = tpu.matmul %0, %1, %cst {dimension_numbers = #tpu.dot_dimension_numbers<[1], [0], [0], [1], [0, 0, 1, 1], [], []>} : vector<16x32xf32>, vector<32x128xf32>, vector<16x128xf32> -> vector<16x128xf32>
    %c0_3 = arith.constant 0 : index
    %c0_4 = arith.constant 0 : index
    %3 = vector.load %arg3[%c0_3, %c0_4] : memref<1x128xf32, #tpu.memory_space<vmem>>, vector<1x128xf32>
    %4 = vector.broadcast %3 : vector<1x128xf32> to vector<16x128xf32>
    %5 = arith.addf %2, %4 : vector<16x128xf32>
    %c0_5 = arith.constant 0 : index
    %c0_6 = arith.constant 0 : index
    %6 = vector.load %arg4[%c0_5, %c0_6] : memref<1x128xf32, #tpu.memory_space<vmem>>, vector<1x128xf32>
    %c0_7 = arith.constant 0 : index
    %c0_8 = arith.constant 0 : index
    %7 = vector.load %arg5[%c0_7, %c0_8] : memref<1x128xf32, #tpu.memory_space<vmem>>, vector<1x128xf32>
    %cst_9 = arith.constant dense<0.000000e+00> : vector<16xf32>
    %8 = vector.multi_reduction <add>, %5, %cst_9 [1] : vector<16x128xf32> to vector<16xf32>
    %9 = vector.shape_cast %8 : vector<16xf32> to vector<16x1xf32>
    %cst_10 = arith.constant 1.280000e+02 : f32
    %10 = vector.broadcast %cst_10 : f32 to vector<16x1xf32>
    %11 = arith.divf %9, %10 : vector<16x1xf32>
    %12 = arith.mulf %5, %5 : vector<16x128xf32>
    %cst_11 = arith.constant dense<0.000000e+00> : vector<16xf32>
    %13 = vector.multi_reduction <add>, %12, %cst_11 [1] : vector<16x128xf32> to vector<16xf32>
    %14 = vector.shape_cast %13 : vector<16xf32> to vector<16x1xf32>
    %cst_12 = arith.constant 1.280000e+02 : f32
    %15 = vector.broadcast %cst_12 : f32 to vector<16x1xf32>
    %16 = arith.divf %14, %15 : vector<16x1xf32>
    %17 = arith.mulf %11, %11 : vector<16x1xf32>
    %18 = arith.subf %16, %17 : vector<16x1xf32>
    %cst_13 = arith.constant 0.000000e+00 : f32
    %19 = vector.broadcast %cst_13 : f32 to vector<16x1xf32>
    %20 = arith.maximumf %18, %19 : vector<16x1xf32>
    %21 = vector.broadcast %11 : vector<16x1xf32> to vector<16x128xf32>
    %22 = arith.subf %5, %21 : vector<16x128xf32>
    %cst_14 = arith.constant 9.99999974E-6 : f32
    %23 = vector.broadcast %cst_14 : f32 to vector<16x1xf32>
    %24 = arith.addf %20, %23 : vector<16x1xf32>
    %25 = math.rsqrt %24 : vector<16x1xf32>
    %26 = vector.broadcast %25 : vector<16x1xf32> to vector<16x128xf32>
    %27 = arith.mulf %22, %26 : vector<16x128xf32>
    %28 = vector.broadcast %6 : vector<1x128xf32> to vector<16x128xf32>
    %29 = arith.mulf %27, %28 : vector<16x128xf32>
    %30 = vector.broadcast %7 : vector<1x128xf32> to vector<16x128xf32>
    %31 = arith.addf %29, %30 : vector<16x128xf32>
    %cst_15 = arith.constant 0.000000e+00 : f32
    %32 = vector.broadcast %cst_15 : f32 to vector<16x128xf32>
    %33 = arith.maximumf %31, %32 : vector<16x128xf32>
    %c0_16 = arith.constant 0 : index
    %c0_17 = arith.constant 0 : index
    %34 = vector.load %arg6[%c0_16, %c0_17] : memref<128x128xf32, #tpu.memory_space<vmem>>, vector<128x128xf32>
    %cst_18 = arith.constant dense<0.000000e+00> : vector<16x128xf32>
    %35 = tpu.matmul %33, %34, %cst_18 {dimension_numbers = #tpu.dot_dimension_numbers<[1], [0], [0], [1], [0, 0, 1, 1], [], []>} : vector<16x128xf32>, vector<128x128xf32>, vector<16x128xf32> -> vector<16x128xf32>
    %c0_19 = arith.constant 0 : index
    %c0_20 = arith.constant 0 : index
    %36 = vector.load %arg7[%c0_19, %c0_20] : memref<1x128xf32, #tpu.memory_space<vmem>>, vector<1x128xf32>
    %37 = vector.broadcast %36 : vector<1x128xf32> to vector<16x128xf32>
    %38 = arith.addf %35, %37 : vector<16x128xf32>
    %c0_21 = arith.constant 0 : index
    %c0_22 = arith.constant 0 : index
    %39 = vector.load %arg8[%c0_21, %c0_22] : memref<1x128xf32, #tpu.memory_space<vmem>>, vector<1x128xf32>
    %c0_23 = arith.constant 0 : index
    %c0_24 = arith.constant 0 : index
    %40 = vector.load %arg9[%c0_23, %c0_24] : memref<1x128xf32, #tpu.memory_space<vmem>>, vector<1x128xf32>
    %cst_25 = arith.constant dense<0.000000e+00> : vector<16xf32>
    %41 = vector.multi_reduction <add>, %38, %cst_25 [1] : vector<16x128xf32> to vector<16xf32>
    %42 = vector.shape_cast %41 : vector<16xf32> to vector<16x1xf32>
    %cst_26 = arith.constant 1.280000e+02 : f32
    %43 = vector.broadcast %cst_26 : f32 to vector<16x1xf32>
    %44 = arith.divf %42, %43 : vector<16x1xf32>
    %45 = arith.mulf %38, %38 : vector<16x128xf32>
    %cst_27 = arith.constant dense<0.000000e+00> : vector<16xf32>
    %46 = vector.multi_reduction <add>, %45, %cst_27 [1] : vector<16x128xf32> to vector<16xf32>
    %47 = vector.shape_cast %46 : vector<16xf32> to vector<16x1xf32>
    %cst_28 = arith.constant 1.280000e+02 : f32
    %48 = vector.broadcast %cst_28 : f32 to vector<16x1xf32>
    %49 = arith.divf %47, %48 : vector<16x1xf32>
    %50 = arith.mulf %44, %44 : vector<16x1xf32>
    %51 = arith.subf %49, %50 : vector<16x1xf32>
    %cst_29 = arith.constant 0.000000e+00 : f32
    %52 = vector.broadcast %cst_29 : f32 to vector<16x1xf32>
    %53 = arith.maximumf %51, %52 : vector<16x1xf32>
    %54 = vector.broadcast %44 : vector<16x1xf32> to vector<16x128xf32>
    %55 = arith.subf %38, %54 : vector<16x128xf32>
    %cst_30 = arith.constant 9.99999974E-6 : f32
    %56 = vector.broadcast %cst_30 : f32 to vector<16x1xf32>
    %57 = arith.addf %53, %56 : vector<16x1xf32>
    %58 = math.rsqrt %57 : vector<16x1xf32>
    %59 = vector.broadcast %58 : vector<16x1xf32> to vector<16x128xf32>
    %60 = arith.mulf %55, %59 : vector<16x128xf32>
    %61 = vector.broadcast %39 : vector<1x128xf32> to vector<16x128xf32>
    %62 = arith.mulf %60, %61 : vector<16x128xf32>
    %63 = vector.broadcast %40 : vector<1x128xf32> to vector<16x128xf32>
    %64 = arith.addf %62, %63 : vector<16x128xf32>
    %cst_31 = arith.constant 0.000000e+00 : f32
    %65 = vector.broadcast %cst_31 : f32 to vector<16x128xf32>
    %66 = arith.maximumf %64, %65 : vector<16x128xf32>
    %c0_32 = arith.constant 0 : index
    %c0_33 = arith.constant 0 : index
    %67 = vector.load %arg10[%c0_32, %c0_33] : memref<128x128xf32, #tpu.memory_space<vmem>>, vector<128x128xf32>
    %cst_34 = arith.constant dense<0.000000e+00> : vector<16x128xf32>
    %68 = tpu.matmul %66, %67, %cst_34 {dimension_numbers = #tpu.dot_dimension_numbers<[1], [0], [0], [1], [0, 0, 1, 1], [], []>} : vector<16x128xf32>, vector<128x128xf32>, vector<16x128xf32> -> vector<16x128xf32>
    %c0_35 = arith.constant 0 : index
    %c0_36 = arith.constant 0 : index
    %69 = vector.load %arg11[%c0_35, %c0_36] : memref<1x128xf32, #tpu.memory_space<vmem>>, vector<1x128xf32>
    %70 = vector.broadcast %69 : vector<1x128xf32> to vector<16x128xf32>
    %71 = arith.addf %68, %70 : vector<16x128xf32>
    %72 = tpu.iota {dimensions = array<i32: 1>} : vector<1x128xi32>
    %c64_i32 = arith.constant 64 : i32
    %73 = vector.broadcast %c64_i32 : i32 to vector<1x128xi32>
    %74 = arith.cmpi slt, %72, %73 : vector<1x128xi32>
    %cst_37 = arith.constant 0.000000e+00 : f32
    %75 = vector.shape_cast %74 : vector<1x128xi1> to vector<1x128xi1>
    %76 = vector.broadcast %75 : vector<1x128xi1> to vector<16x128xi1>
    %77 = vector.broadcast %cst_37 : f32 to vector<16x128xf32>
    %78 = arith.select %76, %71, %77 : vector<16x128xi1>, vector<16x128xf32>
    %79 = arith.subf %71, %78 : vector<16x128xf32>
    %cst_38 = arith.constant dense<0.000000e+00> : vector<16xf32>
    %80 = vector.multi_reduction <add>, %78, %cst_38 [1] : vector<16x128xf32> to vector<16xf32>
    %81 = vector.shape_cast %80 : vector<16xf32> to vector<16x1xf32>
    %cst_39 = arith.constant 3.125000e-02 : f32
    %82 = vector.broadcast %cst_39 : f32 to vector<16x1xf32>
    %83 = arith.mulf %81, %82 : vector<16x1xf32>
    %cst_40 = arith.constant dense<0.000000e+00> : vector<16xf32>
    %84 = vector.multi_reduction <add>, %79, %cst_40 [1] : vector<16x128xf32> to vector<16xf32>
    %85 = vector.shape_cast %84 : vector<16xf32> to vector<16x1xf32>
    %cst_41 = arith.constant 3.125000e-02 : f32
    %86 = vector.broadcast %cst_41 : f32 to vector<16x1xf32>
    %87 = arith.mulf %85, %86 : vector<16x1xf32>
    %88 = arith.mulf %78, %78 : vector<16x128xf32>
    %cst_42 = arith.constant dense<0.000000e+00> : vector<16xf32>
    %89 = vector.multi_reduction <add>, %88, %cst_42 [1] : vector<16x128xf32> to vector<16xf32>
    %90 = vector.shape_cast %89 : vector<16xf32> to vector<16x1xf32>
    %cst_43 = arith.constant 3.125000e-02 : f32
    %91 = vector.broadcast %cst_43 : f32 to vector<16x1xf32>
    %92 = arith.mulf %90, %91 : vector<16x1xf32>
    %93 = arith.mulf %79, %79 : vector<16x128xf32>
    %cst_44 = arith.constant dense<0.000000e+00> : vector<16xf32>
    %94 = vector.multi_reduction <add>, %93, %cst_44 [1] : vector<16x128xf32> to vector<16xf32>
    %95 = vector.shape_cast %94 : vector<16xf32> to vector<16x1xf32>
    %cst_45 = arith.constant 3.125000e-02 : f32
    %96 = vector.broadcast %cst_45 : f32 to vector<16x1xf32>
    %97 = arith.mulf %95, %96 : vector<16x1xf32>
    %98 = arith.mulf %83, %83 : vector<16x1xf32>
    %99 = arith.subf %92, %98 : vector<16x1xf32>
    %cst_46 = arith.constant 0.000000e+00 : f32
    %100 = vector.broadcast %cst_46 : f32 to vector<16x1xf32>
    %101 = arith.maximumf %99, %100 : vector<16x1xf32>
    %102 = arith.mulf %87, %87 : vector<16x1xf32>
    %103 = arith.subf %97, %102 : vector<16x1xf32>
    %cst_47 = arith.constant 0.000000e+00 : f32
    %104 = vector.broadcast %cst_47 : f32 to vector<16x1xf32>
    %105 = arith.maximumf %103, %104 : vector<16x1xf32>
    %106 = vector.shape_cast %74 : vector<1x128xi1> to vector<1x128xi1>
    %107 = vector.broadcast %106 : vector<1x128xi1> to vector<16x128xi1>
    %108 = vector.shape_cast %83 : vector<16x1xf32> to vector<16x1xf32>
    %109 = vector.broadcast %108 : vector<16x1xf32> to vector<16x128xf32>
    %110 = vector.shape_cast %87 : vector<16x1xf32> to vector<16x1xf32>
    %111 = vector.broadcast %110 : vector<16x1xf32> to vector<16x128xf32>
    %112 = arith.select %107, %109, %111 : vector<16x128xi1>, vector<16x128xf32>
    %cst_48 = arith.constant 9.99999974E-6 : f32
    %113 = vector.broadcast %cst_48 : f32 to vector<16x1xf32>
    %114 = arith.addf %101, %113 : vector<16x1xf32>
    %115 = math.rsqrt %114 : vector<16x1xf32>
    %cst_49 = arith.constant 9.99999974E-6 : f32
    %116 = vector.broadcast %cst_49 : f32 to vector<16x1xf32>
    %117 = arith.addf %105, %116 : vector<16x1xf32>
    %118 = math.rsqrt %117 : vector<16x1xf32>
    %119 = vector.shape_cast %74 : vector<1x128xi1> to vector<1x128xi1>
    %120 = vector.broadcast %119 : vector<1x128xi1> to vector<16x128xi1>
    %121 = vector.shape_cast %115 : vector<16x1xf32> to vector<16x1xf32>
    %122 = vector.broadcast %121 : vector<16x1xf32> to vector<16x128xf32>
    %123 = vector.shape_cast %118 : vector<16x1xf32> to vector<16x1xf32>
    %124 = vector.broadcast %123 : vector<16x1xf32> to vector<16x128xf32>
    %125 = arith.select %120, %122, %124 : vector<16x128xi1>, vector<16x128xf32>
    %126 = arith.subf %71, %112 : vector<16x128xf32>
    %127 = arith.mulf %126, %125 : vector<16x128xf32>
    %c0_50 = arith.constant 0 : index
    %c0_51 = arith.constant 0 : index
    %128 = vector.load %arg12[%c0_50, %c0_51] : memref<1x128xf32, #tpu.memory_space<vmem>>, vector<1x128xf32>
    %129 = vector.broadcast %128 : vector<1x128xf32> to vector<16x128xf32>
    %130 = arith.mulf %127, %129 : vector<16x128xf32>
    %c0_52 = arith.constant 0 : index
    %c0_53 = arith.constant 0 : index
    %131 = vector.load %arg13[%c0_52, %c0_53] : memref<1x128xf32, #tpu.memory_space<vmem>>, vector<1x128xf32>
    %132 = vector.broadcast %131 : vector<1x128xf32> to vector<16x128xf32>
    %133 = arith.addf %130, %132 : vector<16x128xf32>
    %cst_54 = arith.constant -2.000000e+01 : f32
    %cst_55 = arith.constant 2.000000e+00 : f32
    %134 = vector.broadcast %cst_54 : f32 to vector<16x128xf32>
    %135 = arith.maximumf %134, %133 : vector<16x128xf32>
    %136 = vector.broadcast %cst_55 : f32 to vector<16x128xf32>
    %137 = arith.minimumf %136, %135 : vector<16x128xf32>
    %138 = math.exp %137 : vector<16x128xf32>
    %cst_56 = arith.constant 1.000000e-03 : f32
    %cst_57 = arith.constant 1.000000e+02 : f32
    %139 = vector.broadcast %cst_56 : f32 to vector<16x128xf32>
    %140 = arith.maximumf %139, %138 : vector<16x128xf32>
    %141 = vector.broadcast %cst_57 : f32 to vector<16x128xf32>
    %142 = arith.minimumf %141, %140 : vector<16x128xf32>
    %143 = vector.shape_cast %74 : vector<1x128xi1> to vector<1x128xi1>
    %144 = vector.broadcast %143 : vector<1x128xi1> to vector<16x128xi1>
    %145 = arith.select %144, %133, %142 : vector<16x128xi1>, vector<16x128xf32>
    %c0_58 = arith.constant 0 : index
    %c0_59 = arith.constant 0 : index
    %146 = vector.load %arg14[%c0_58, %c0_59] : memref<16x128xf32, #tpu.memory_space<vmem>>, vector<16x128xf32>
    tpu.vector_store %arg14[%c0_58, %c0_59], %145 {strides = array<i32>} : memref<16x128xf32, #tpu.memory_space<vmem>>, vector<16x128xf32>,
    return
  }
  func.func @transform_0(%arg0: i32) -> (i32, i32) {
    %c0_i32 = arith.constant 0 : i32
    %c0_i32_0 = arith.constant 0 : i32
    return %arg0, %c0_i32 : i32, i32
  }
  func.func @transform_1(%arg0: i32) -> (i32, i32) {
    %c0_i32 = arith.constant 0 : i32
    %c0_i32_0 = arith.constant 0 : i32
    %c0_i32_1 = arith.constant 0 : i32
    return %c0_i32, %c0_i32_0 : i32, i32
  }
  func.func @transform_2(%arg0: i32) -> (i32, i32) {
    %c0_i32 = arith.constant 0 : i32
    %c0_i32_0 = arith.constant 0 : i32
    %c0_i32_1 = arith.constant 0 : i32
    return %c0_i32, %c0_i32_0 : i32, i32
  }
  func.func @transform_3(%arg0: i32) -> (i32, i32) {
    %c0_i32 = arith.constant 0 : i32
    %c0_i32_0 = arith.constant 0 : i32
    %c0_i32_1 = arith.constant 0 : i32
    return %c0_i32, %c0_i32_0 : i32, i32
  }
  func.func @transform_4(%arg0: i32) -> (i32, i32) {
    %c0_i32 = arith.constant 0 : i32
    %c0_i32_0 = arith.constant 0 : i32
    %c0_i32_1 = arith.constant 0 : i32
    return %c0_i32, %c0_i32_0 : i32, i32
  }
  func.func @transform_5(%arg0: i32) -> (i32, i32) {
    %c0_i32 = arith.constant 0 : i32
    %c0_i32_0 = arith.constant 0 : i32
    %c0_i32_1 = arith.constant 0 : i32
    return %c0_i32, %c0_i32_0 : i32, i32
  }
  func.func @transform_6(%arg0: i32) -> (i32, i32) {
    %c0_i32 = arith.constant 0 : i32
    %c0_i32_0 = arith.constant 0 : i32
    %c0_i32_1 = arith.constant 0 : i32
    return %c0_i32, %c0_i32_0 : i32, i32
  }
  func.func @transform_7(%arg0: i32) -> (i32, i32) {
    %c0_i32 = arith.constant 0 : i32
    %c0_i32_0 = arith.constant 0 : i32
    %c0_i32_1 = arith.constant 0 : i32
    return %c0_i32, %c0_i32_0 : i32, i32
  }
  func.func @transform_8(%arg0: i32) -> (i32, i32) {
    %c0_i32 = arith.constant 0 : i32
    %c0_i32_0 = arith.constant 0 : i32
    %c0_i32_1 = arith.constant 0 : i32
    return %c0_i32, %c0_i32_0 : i32, i32
  }
  func.func @transform_9(%arg0: i32) -> (i32, i32) {
    %c0_i32 = arith.constant 0 : i32
    %c0_i32_0 = arith.constant 0 : i32
    %c0_i32_1 = arith.constant 0 : i32
    return %c0_i32, %c0_i32_0 : i32, i32
  }
  func.func @transform_10(%arg0: i32) -> (i32, i32) {
    %c0_i32 = arith.constant 0 : i32
    %c0_i32_0 = arith.constant 0 : i32
    %c0_i32_1 = arith.constant 0 : i32
    return %c0_i32, %c0_i32_0 : i32, i32
  }
  func.func @transform_11(%arg0: i32) -> (i32, i32) {
    %c0_i32 = arith.constant 0 : i32
    %c0_i32_0 = arith.constant 0 : i32
    %c0_i32_1 = arith.constant 0 : i32
    return %c0_i32, %c0_i32_0 : i32, i32
  }
  func.func @transform_12(%arg0: i32) -> (i32, i32) {
    %c0_i32 = arith.constant 0 : i32
    %c0_i32_0 = arith.constant 0 : i32
    %c0_i32_1 = arith.constant 0 : i32
    return %c0_i32, %c0_i32_0 : i32, i32
  }
  func.func @transform_13(%arg0: i32) -> (i32, i32) {
    %c0_i32 = arith.constant 0 : i32
    %c0_i32_0 = arith.constant 0 : i32
    return %arg0, %c0_i32 : i32, i32
  }
}

</mosaic_0001>

<bundles_post_ra>
// kernel: policy_forward.1
= control target key start
LH: loop header
LB: loop body
LE: loop exit
PB: predicated region body
PF: predicated region fallthrough
CT: control target
= control target key end

     0   :  { %18 = vsyncpa [#allocation3], 0  ;;  %s1060_s0 = inlined_call_operand.hbm [shape: f32[16,32], index: 0, kind: input, shape index: {}]   ;;  %s1061_s1 = inlined_call_operand.hbm [shape: f32[32,128], index: 1, kind: input, shape index: {}]   ;;  %s1062_s2 = inlined_call_operand.vmem [shape: f32[1,128], index: 2, kind: input, shape index: {}]   ;;  %s1063_s3 = inlined_call_operand.vmem [shape: f32[1,128], index: 3, kind: input, shape index: {}]   ;;  %s1064_s4 = inlined_call_operand.vmem [shape: f32[1,128], index: 4, kind: input, shape index: {}]   ;;  %s1065_s5 = inlined_call_operand.hbm [shape: f32[128,128], index: 5, kind: input, shape index: {}]   ;;  %s1066_s6 = inlined_call_operand.hbm [shape: f32[1,128], index: 6, kind: input, shape index: {}]   ;;  %s1067_s7 = inlined_call_operand.vmem [shape: f32[1,128], index: 7, kind: input, shape index: {}]   ;;  %s1068_s8 = inlined_call_operand.vmem [shape: f32[1,128], index: 8, kind: input, shape index: {}]   ;;  %s1069_s9 = inlined_call_operand.hbm [shape: f32[128,128], index: 9, kind: input, shape index: {}]   ;;  %s1070_s10 = inlined_call_operand.vmem [shape: f32[1,128], index: 10, kind: input, shape index: {}]   ;;  %s1071_s11 = inlined_call_operand.vmem [shape: f32[1,128], index: 11, kind: input, shape index: {}]   ;;  %s1072_s12 = inlined_call_operand.vmem [shape: f32[1,128], index: 12, kind: input, shape index: {}]   ;;  %s1073_s13 = inlined_call_operand.vmem [shape: f32[16,128], index: 13, kind: output, shape index: {}]  }
   0x1   :  { %19 = vsyncpa [#allocation5], 0 }
   0x2   :  { %20 = vsyncpa [#allocation8], 0  ;;  %s871_s25 = smov [#allocation4]   ;;  %s872_s27 = smov [#allocation7]  }
   0x3   :  { %s38_s26 = sshll.u32 %s871_s25, 4  ;;  %s69_s28 = sshll.u32 %s872_s27, 4  ;;  %s39_s26 = int_to_ptr.vmem [resolvable:$true] %s38_s26  ;;  %s70_s28 = int_to_ptr.vmem [resolvable:$true] %s69_s28 }
   0x4   :  { %s773_s29 = scalar_lea.vmem %s39_s26, 512  ;;  %p778_p1 = scmp.lt.s32.totalorder %s39_s26, %s39_s26 }
   0x5   :  { %p774_p0 = scmp.ne.s32.totalorder %s39_s26, %s773_s29  ;;  %p779_p2 = scmp.lt.s32.totalorder %s773_s29, %s773_s29 }
   0x7   :  { %p780_p3 = por %p779_p2, %p778_p1 }
   0x9   :  { %p781_p4 = pnand %p780_p3, %p774_p0 }
   0xb   :  { %784 = shalt.err (!%p781_p4)
}
   0xc   :  { %s873_s30 = smov 128   ;;  %s874_s14 = smov 8  }
   0xd   :  { %44 = dma.hbm_to_vmem [thread:$0]  %s1061_s1, 512, %s39_s26, [#allocation5], %s873_s30, %s873_s30, %s874_s14  }
   0xe   :  { %s793_s17 = scalar_lea.vmem %s70_s28, 16  ;;  %s797_s18 = scalar_lea.vmem %s70_s28, 32 }
   0xf   :  { %p794_p5 = scmp.ne.s32.totalorder %s70_s28, %s793_s17  ;;  %p798_p6 = scmp.lt.s32.totalorder %s70_s28, %s70_s28 }
  0x10   :  { %p799_p7 = scmp.lt.s32.totalorder %s797_s18, %s793_s17 }
  0x12   :  { %p800_p8 = por %p799_p7, %p798_p6 }
  0x14   :  { %p801_p9 = pnand %p800_p8, %p794_p5 }
  0x16   :  { %804 = shalt.err (!%p801_p9)
}
  0x17   :  { %72 = dma.hbm_to_vmem [thread:$0]  %s1066_s6, 16, %s70_s28, [#allocation8]  }
  0x18   :  { %s875_s21 = smov [#allocation2]   ;;  %s876_s23 = smov [#allocation6]  }
  0x19   :  { %s26_s22 = sshll.u32 %s875_s21, 4  ;;  %s56_s24 = sshll.u32 %s876_s23, 4  ;;  %s27_s22 = int_to_ptr.vmem [resolvable:$true] %s26_s22  ;;  %s57_s24 = int_to_ptr.vmem [resolvable:$true] %s56_s24 }
  0x1a   :  { %s813_s25 = scalar_lea.vmem %s27_s22, 256  ;;  %p818_p11 = scmp.lt.s32.totalorder %s27_s22, %s27_s22 }
  0x1b   :  { %p814_p10 = scmp.ne.s32.totalorder %s27_s22, %s813_s25  ;;  %p819_p12 = scmp.lt.s32.totalorder %s813_s25, %s813_s25 }
  0x1d   :  { %p820_p13 = por %p819_p12, %p818_p11 }
  0x1f   :  { %p821_p0 = pnand %p820_p13, %p814_p10 }
  0x21   :  { %824 = shalt.err (!%p821_p0)
}
  0x22   :  { %32 = dma.hbm_to_vmem [thread:$0]  %s1060_s0, 256, %s27_s22, [#allocation3], %s873_s30, %s873_s30, %s874_s14  }
  0x23   :  { %s833_s6 = scalar_lea.vmem %s57_s24, 2048  ;;  %p838_p2 = scmp.lt.s32.totalorder %s57_s24, %s57_s24 }
  0x24   :  { %p834_p1 = scmp.ne.s32.totalorder %s57_s24, %s833_s6  ;;  %p839_p3 = scmp.lt.s32.totalorder %s833_s6, %s833_s6 }
  0x26   :  { %p840_p4 = por %p839_p3, %p838_p2 }
  0x28   :  { %p841_p5 = pnand %p840_p4, %p834_p1 }
  0x2a   :  { %844 = shalt.err (!%p841_p5)
}
  0x2b   :  { %62 = dma.hbm_to_vmem [thread:$0]  %s1065_s5, 2048, %s57_s24, [#allocation5], %s873_s30, %s873_s30, %s874_s14  }
  0x2c   :  { %s877_s29 = smov [#allocation9]  }
  0x2d   :  { %s82_s15 = sshll.u32 %s877_s29, 4  ;;  %s83_s15 = int_to_ptr.vmem [resolvable:$true] %s82_s15 }
  0x2e   :  { %s853_s16 = scalar_lea.vmem %s83_s15, 2048  ;;  %p858_p7 = scmp.lt.s32.totalorder %s83_s15, %s83_s15 }
  0x2f   :  { %p854_p6 = scmp.ne.s32.totalorder %s83_s15, %s853_s16  ;;  %p859_p8 = scmp.lt.s32.totalorder %s853_s16, %s853_s16 }
  0x31   :  { %p860_p9 = por %p859_p8, %p858_p7 }
  0x33   :  { %p861_p10 = pnand %p860_p9, %p854_p6 }
  0x35   :  { %864 = shalt.err (!%p861_p10)
}
  0x36   :  { %88 = dma.hbm_to_vmem [thread:$0]  %s1069_s9, 2048, %s83_s15, [#allocation8], %s873_s30, %s873_s30, %s874_s14  }
  0x37   :  { %865 = dma.done.wait [#allocation3], 256  }
  0x38   :  { %866 = vsyncadd [#allocation3], 4294967040 }
  0x39   :  { %867 = dma.done.wait [#allocation5], 2560  }
  0x3a   :  { %868 = vsyncadd [#allocation5], 4294964736 }
  0x3b   :  { %869 = dma.done.wait [#allocation8], 2064  }
  0x3c   :  { %870 = vsyncadd [#allocation8], 4294965232  ;;  %vm123_vm0 = vcmask 261120   ;;  %v115_v0 = vld [vmem:[#allocation4 + $0x18] sm:$0xff]  ;;  %v114_v1 = vld [vmem:[#allocation4 + $0x10] sm:$0xff] }
  0x3d   :  { %657 = vmatprep.subr.mxu0 %v115_v0  ;;  %v110_v2 = vld [vmem:[#allocation2] sm:$0xff]  ;;  %v113_v3 = vld [vmem:[#allocation4 + $0x8] sm:$0xff]  ;;  %v112_v4 = vld [vmem:[#allocation4] sm:$0xff] }
  0x3e   :  { %658 = vmatpush3.msra.mxu0 %v115_v0  ;;  %665 = vmatprep.mubr.msk.f32.mxu0 %vm123_vm0, %v110_v2  ;;  %v111_v5 = vld [vmem:[#allocation2 + $0x8] sm:$0xff]  ;;  %v604_v7 = vld [vmem:[%s1062_s2] ss:$0 sm:$0xff]  ;;  %v267_v15 = vld [vmem:[#allocation6 + $0x68] sm:$0xff] }
  0x3f   :  { %659 = vmatprep.subr.mxu0 %v114_v1  ;;  %v269_v13 = vld [vmem:[#allocation6 + $0x78] sm:$0xff]  ;;  %v268_v14 = vld [vmem:[#allocation6 + $0x70] sm:$0xff]  ;;  %v266_v16 = vld [vmem:[#allocation6 + $0x60] sm:$0xff] }
  0x40   :  { %660 = vmatpush3.msra.mxu0 %v114_v1  ;;  %668 = vmatprep.subr.mxu1 %v269_v13  ;;  %v265_v17 = vld [vmem:[#allocation6 + $0x58] sm:$0xff]  ;;  %v264_v18 = vld [vmem:[#allocation6 + $0x50] sm:$0xff]  ;;  %v263_v19 = vld [vmem:[#allocation6 + $0x48] sm:$0xff] }
  0x41   :  { %661 = vmatprep.subr.mxu0 %v113_v3  ;;  %669 = vmatpush3.msra.mxu1 %v269_v13  ;;  %v262_v20 = vld [vmem:[#allocation6 + $0x40] sm:$0xff]  ;;  %v261_v21 = vld [vmem:[#allocation6 + $0x38] sm:$0xff]  ;;  %v260_v22 = vld [vmem:[#allocation6 + $0x30] sm:$0xff] }
  0x42   :  { %662 = vmatpush3.msra.mxu0 %v113_v3  ;;  %670 = vmatprep.subr.mxu1 %v268_v14  ;;  %v259_v23 = vld [vmem:[#allocation6 + $0x28] sm:$0xff]  ;;  %v258_v24 = vld [vmem:[#allocation6 + $0x20] sm:$0xff]  ;;  %v257_v25 = vld [vmem:[#allocation6 + $0x18] sm:$0xff] }
  0x43   :  { %663 = vmatprep.subr.mxu0 %v112_v4  ;;  %671 = vmatpush3.msra.mxu1 %v268_v14  ;;  %v256_v26 = vld [vmem:[#allocation6 + $0x10] sm:$0xff]  ;;  %v255_v27 = vld [vmem:[#allocation6 + $0x8] sm:$0xff]  ;;  %v254_v28 = vld [vmem:[#allocation6] sm:$0xff] }
  0x44   :  { %664 = vmatpush3.msra.mxu0 %v112_v4  ;;  %672 = vmatprep.subr.mxu1 %v267_v15  ;;  %v607_v47 = vld [vmem:[%s1063_s3] ss:$0 sm:$0xff]  ;;  %v609_v59 = vld [vmem:[#allocation7] ss:$0 sm:$0xff]  ;;  %v414_v3 = vld [vmem:[#allocation9 + $0x70] sm:$0xff] }
  0x45   :  { %666 = vmatmul.mubr.msk.f32.vlgmr.msra.gmra.mxu0 %vm123_vm0, %v111_v5  ;;  %673 = vmatpush3.msra.mxu1 %v267_v15  ;;  %v608_v49 = vld [vmem:[%s1064_s4] ss:$0 sm:$0xff]  ;;  %v415_v2 = vld [vmem:[#allocation9 + $0x78] sm:$0xff]  ;;  %v412_v5 = vld [vmem:[#allocation9 + $0x60] sm:$0xff] }
  0x46   :  { %674 = vmatprep.subr.mxu1 %v266_v16  ;;  %703 = vmatprep.subr.mxu0 %v415_v2  ;;  %v413_v4 = vld [vmem:[#allocation9 + $0x68] sm:$0xff]  ;;  %v404_v13 = vld [vmem:[#allocation9 + $0x20] sm:$0xff]  ;;  %v403_v14 = vld [vmem:[#allocation9 + $0x18] sm:$0xff] }
  0x47   :  { %675 = vmatpush3.msra.mxu1 %v266_v16  ;;  %704 = vmatpush3.msra.mxu0 %v415_v2  ;;  %v402_v15 = vld [vmem:[#allocation9 + $0x10] sm:$0xff]  ;;  %v401_v16 = vld [vmem:[#allocation9 + $0x8] sm:$0xff] }
  0x48   :  { %676 = vmatprep.subr.mxu1 %v265_v17  ;;  %705 = vmatprep.subr.mxu0 %v414_v3 }
  0x49   :  { %677 = vmatpush3.msra.mxu1 %v265_v17  ;;  %706 = vmatpush3.msra.mxu0 %v414_v3  ;;  %v400_v17 = vld [vmem:[#allocation9] sm:$0xff] }
  0x4a   :  { %678 = vmatprep.subr.mxu1 %v264_v18  ;;  %707 = vmatprep.subr.mxu0 %v413_v4 }
  0x4b   :  { %679 = vmatpush3.msra.mxu1 %v264_v18  ;;  %708 = vmatpush3.msra.mxu0 %v413_v4 }
  0x4c   :  { %680 = vmatprep.subr.mxu1 %v263_v19  ;;  %709 = vmatprep.subr.mxu0 %v412_v5 }
  0x4d   :  { %681 = vmatpush3.msra.mxu1 %v263_v19  ;;  %710 = vmatpush3.msra.mxu0 %v412_v5 }
  0x4e   :  { %682 = vmatprep.subr.mxu1 %v262_v20 }
  0x4f   :  { %683 = vmatpush3.msra.mxu1 %v262_v20 }
  0x50   :  { %684 = vmatprep.subr.mxu1 %v261_v21 }
  0x51   :  { %685 = vmatpush3.msra.mxu1 %v261_v21 }
  0x52   :  { %686 = vmatprep.subr.mxu1 %v260_v22 }
  0x53   :  { %687 = vmatpush3.msra.mxu1 %v260_v22 }
  0x54   :  { %688 = vmatprep.subr.mxu1 %v259_v23 }
  0x55   :  { %689 = vmatpush3.msra.mxu1 %v259_v23 }
  0x56   :  { %690 = vmatprep.subr.mxu1 %v258_v24 }
  0x57   :  { %691 = vmatpush3.msra.mxu1 %v258_v24 }
  0x58   :  { %692 = vmatprep.subr.mxu1 %v257_v25 }
  0x59   :  { %693 = vmatpush3.msra.mxu1 %v257_v25 }
  0x5a   :  { %694 = vmatprep.subr.mxu1 %v256_v26 }
  0x5b   :  { %695 = vmatpush3.msra.mxu1 %v256_v26 }
  0x5c   :  { %696 = vmatprep.subr.mxu1 %v255_v27 }
  0x5d   :  { %697 = vmatpush3.msra.mxu1 %v255_v27 }
  0x5e   :  { %698 = vmatprep.subr.mxu1 %v254_v28 }
  0x5f   :  { %699 = vmatpush3.msra.mxu1 %v254_v28 }
 0x105   :  { %v667_v6 = vpop.f32.mrf.mxu0 }
 0x106   :  { %v982_v10 = vadd.f32 %v667_v6, %v604_v7  ;;  %v411_v6 = vld [vmem:[#allocation9 + $0x58] sm:$0xff] }
 0x107   :  { %v196_v8 = vpop.f32.mrf.mxu0  ;;  %711 = vmatprep.subr.mxu0 %v411_v6 }
 0x108   :  { %v980_v9 = vadd.f32 %v604_v7, %v196_v8  ;;  %v215_v12 = vmul.f32 %v982_v10, %v982_v10  ;;  %712 = vmatpush3.msra.mxu0 %v411_v6  ;;  %v410_v7 = vld [vmem:[#allocation9 + $0x50] sm:$0xff]  ;;  %v409_v8 = vld [vmem:[#allocation9 + $0x48] sm:$0xff] }
 0x109   :  { %713 = vmatprep.subr.mxu0 %v410_v7 }
 0x10a   :  { %207 = vadd.xlane.f32.xlu0 %v980_v9  ;;  %v214_v11 = vmul.f32 %v980_v9, %v980_v9  ;;  %714 = vmatpush3.msra.mxu0 %v410_v7 }
 0x10b   :  { %715 = vmatprep.subr.mxu0 %v409_v8 }
 0x10c   :  { %216 = vadd.xlane.f32.xlu1 %v214_v11  ;;  %716 = vmatpush3.msra.mxu0 %v409_v8  ;;  %v406_v11 = vld [vmem:[#allocation9 + $0x30] sm:$0xff] }
 0x10e   :  { %209 = vadd.xlane.f32.xlu0 %v982_v10 }
 0x110   :  { %218 = vadd.xlane.f32.xlu1 %v215_v12  ;;  %v405_v12 = vld [vmem:[#allocation9 + $0x28] sm:$0xff] }
 0x193   :  { %v208_v29 = vpop.xlane.xlu0 %207 }
 0x194   :  { %v212_v30 = vmul.f32 0.0078125, %v208_v29 }
 0x195   :  { %v217_v31 = vpop.xlane.xlu1 %216 }
 0x196   :  { %v222_v32 = vmul.f32 %v212_v30, %v212_v30  ;;  %v220_v33 = vmul.f32 0.0078125, %v217_v31  ;;  %v228_v45 = vsub.f32 %v980_v9, %v212_v30  ;;  %v408_v9 = vld [vmem:[#allocation9 + $0x40] sm:$0xff] }
 0x197   :  { %v210_v34 = vpop.xlane.xlu0 %209  ;;  %717 = vmatprep.subr.mxu0 %v408_v9 }
 0x198   :  { %v224_v35 = vsub.f32 %v220_v33, %v222_v32  ;;  %v213_v36 = vmul.f32 0.0078125, %v210_v34  ;;  %718 = vmatpush3.msra.mxu0 %v408_v9 }
 0x199   :  { %v219_v37 = vpop.xlane.xlu1 %218 }
 0x19a   :  { %v226_v38 = vmax.f32 %v224_v35, 0.0  ;;  %v223_v39 = vmul.f32 %v213_v36, %v213_v36  ;;  %v221_v40 = vmul.f32 0.0078125, %v219_v37  ;;  %v229_v50 = vsub.f32 %v982_v10, %v213_v36  ;;  %v407_v10 = vld [vmem:[#allocation9 + $0x38] sm:$0xff]  ;;  %v610_v36 = vld [vmem:[%s1067_s7] ss:$0 sm:$0xff] }
 0x19b   :  { %719 = vmatprep.subr.mxu0 %v407_v10 }
 0x19c   :  { %v230_v41 = vadd.f32 1e-05, %v226_v38  ;;  %v225_v42 = vsub.f32 %v221_v40, %v223_v39  ;;  %720 = vmatpush3.msra.mxu0 %v407_v10  ;;  %v611_v40 = vld [vmem:[%s1068_s8] ss:$0 sm:$0xff] }
 0x19d   :  { %721 = vmatprep.subr.mxu0 %v406_v11 }
 0x19e   :  { %745 = vrsqrt.f32 %v230_v41  ;;  %v227_v43 = vmax.f32 %v225_v42, 0.0  ;;  %722 = vmatpush3.msra.mxu0 %v406_v11 }
 0x19f   :  { %723 = vmatprep.subr.mxu0 %v405_v12 }
 0x1a0   :  { %v231_v44 = vadd.f32 1e-05, %v227_v43  ;;  %724 = vmatpush3.msra.mxu0 %v405_v12 }
 0x1a1   :  { %725 = vmatprep.subr.mxu0 %v404_v13 }
 0x1a2   :  { %747 = vrsqrt.f32 %v231_v44  ;;  %726 = vmatpush3.msra.mxu0 %v404_v13 }
 0x1a3   :  { %727 = vmatprep.subr.mxu0 %v403_v14 }
 0x1a4   :  { %728 = vmatpush3.msra.mxu0 %v403_v14 }
 0x1a5   :  { %729 = vmatprep.subr.mxu0 %v402_v15 }
 0x1a6   :  { %730 = vmatpush3.msra.mxu0 %v402_v15 }
 0x1a7   :  { %731 = vmatprep.subr.mxu0 %v401_v16 }
 0x1a8   :  { %732 = vmatpush3.msra.mxu0 %v401_v16 }
 0x1a9   :  { %733 = vmatprep.subr.mxu0 %v400_v17 }
 0x1aa   :  { %734 = vmatpush3.msra.mxu0 %v400_v17 }
 0x1ab   :  { %v746_v46 = vpop.eup %745 }
 0x1ac   :  { %v234_v48 = vmul.f32 %v746_v46, %v228_v45 }
 0x1ae   :  { %v242_v51 = vmul.f32 %v607_v47, %v234_v48  ;;  %v498_v48 = vlaneseq }
 0x1af   :  { %v748_v52 = vpop.eup %747 }
 0x1b0   :  { %v235_v53 = vmul.f32 %v748_v52, %v229_v50  ;;  %v250_v54 = vadd.f32 %v608_v49, %v242_v51  ;;  %v612_v50 = vld [vmem:[%s1070_s10] ss:$0 sm:$0xff] }
 0x1b2   :  { %v243_v55 = vmul.f32 %v607_v47, %v235_v53  ;;  %v252_v56 = vmax.f32 %v250_v54, 0.0 }
 0x1b4   :  { %v251_v57 = vadd.f32 %v608_v49, %v243_v55  ;;  %700 = vmatprep.mubr.f32.mxu1 %v252_v56  ;;  %v1016_v49 = vand.u32 127, %v498_v48 }
 0x1b6   :  { %v253_v58 = vmax.f32 %v251_v57, 0.0  ;;  %vm500_vm1 = vcmp.lt.s32.totalorder %v1016_v49, 64 }
 0x1b8   :  { %701 = vmatmul.mubr.f32.vlgmr.msra.gmra.mxu1 %v253_v58 }
 0x278   :  { %v702_v60 = vpop.f32.mrf.mxu1 }
 0x279   :  { %v998_v61 = vadd.f32 %v702_v60, %v609_v59 }
 0x27a   :  { %v343_v62 = vpop.f32.mrf.mxu1 }
 0x27b   :  { %v1000_v63 = vadd.f32 %v609_v59, %v343_v62  ;;  %356 = vadd.xlane.f32.xlu1 %v998_v61  ;;  %v361_v0 = vmul.f32 %v998_v61, %v998_v61 }
 0x27d   :  { %354 = vadd.xlane.f32.xlu0 %v1000_v63  ;;  %v360_v1 = vmul.f32 %v1000_v63, %v1000_v63 }
 0x27f   :  { %364 = vadd.xlane.f32.xlu1 %v361_v0 }
 0x281   :  { %362 = vadd.xlane.f32.xlu0 %v360_v1 }
 0x304   :  { %v357_v18 = vpop.xlane.xlu1 %356 }
 0x305   :  { %v359_v19 = vmul.f32 0.0078125, %v357_v18 }
 0x306   :  { %v355_v20 = vpop.xlane.xlu0 %354 }
 0x307   :  { %v358_v21 = vmul.f32 0.0078125, %v355_v20  ;;  %v369_v23 = vmul.f32 %v359_v19, %v359_v19  ;;  %v375_v34 = vsub.f32 %v998_v61, %v359_v19 }
 0x308   :  { %v365_v22 = vpop.xlane.xlu1 %364 }
 0x309   :  { %v367_v24 = vmul.f32 0.0078125, %v365_v22  ;;  %v368_v26 = vmul.f32 %v358_v21, %v358_v21  ;;  %v374_v37 = vsub.f32 %v1000_v63, %v358_v21 }
 0x30a   :  { %v363_v25 = vpop.xlane.xlu0 %362 }
 0x30b   :  { %v371_v27 = vsub.f32 %v367_v24, %v369_v23  ;;  %v366_v28 = vmul.f32 0.0078125, %v363_v25 }
 0x30d   :  { %v373_v29 = vmax.f32 %v371_v27, 0.0  ;;  %v370_v30 = vsub.f32 %v366_v28, %v368_v26 }
 0x30f   :  { %v377_v31 = vadd.f32 1e-05, %v373_v29  ;;  %v372_v32 = vmax.f32 %v370_v30, 0.0 }
 0x311   :  { %749 = vrsqrt.f32 %v377_v31  ;;  %v376_v33 = vadd.f32 1e-05, %v372_v32 }
 0x313   :  { %751 = vrsqrt.f32 %v376_v33 }
 0x31e   :  { %v750_v35 = vpop.eup %749 }
 0x31f   :  { %v381_v38 = vmul.f32 %v750_v35, %v375_v34 }
 0x320   :  { %v752_v39 = vpop.eup %751 }
 0x321   :  { %v380_v41 = vmul.f32 %v752_v39, %v374_v37  ;;  %v389_v42 = vmul.f32 %v610_v36, %v381_v38  ;;  %v613_v37 = vld [vmem:[%s1071_s11] ss:$0 sm:$0xff] }
 0x323   :  { %v388_v43 = vmul.f32 %v610_v36, %v380_v41  ;;  %v397_v44 = vadd.f32 %v611_v40, %v389_v42  ;;  %v614_v42 = vld [vmem:[%s1072_s12] ss:$0 sm:$0xff] }
 0x325   :  { %v396_v45 = vadd.f32 %v611_v40, %v388_v43  ;;  %v399_v47 = vmax.f32 %v397_v44, 0.0 }
 0x327   :  { %v398_v46 = vmax.f32 %v396_v45, 0.0 }
 0x329   :  { %735 = vmatprep.mubr.f32.mxu0 %v398_v46 }
 0x32a   :  { %736 = vmatmul.mubr.f32.vlgmr.msra.gmra.mxu0 %v399_v47 }
 0x3ea   :  { %v737_v51 = vpop.f32.mrf.mxu0 }
 0x3eb   :  { %v1022_v52 = vadd.f32 %v737_v51, %v612_v50 }
 0x3ec   :  { %v489_v53 = vpop.f32.mrf.mxu0 }
 0x3ed   :  { %v1024_v54 = vadd.f32 %v612_v50, %v489_v53  ;;  %v504_v55 = vsel %vm500_vm1, %v1022_v52, 0.0 }
 0x3ee   :  { %509 = vadd.xlane.f32.xlu1 %v504_v55  ;;  %v506_v57 = vsub.f32 %v1022_v52, %v504_v55  ;;  %v520_v59 = vmul.f32 %v504_v55, %v504_v55 }
 0x3ef   :  { %v503_v56 = vsel %vm500_vm1, %v1024_v54, 0.0 }
 0x3f0   :  { %507 = vadd.xlane.f32.xlu0 %v503_v56  ;;  %v505_v58 = vsub.f32 %v1024_v54, %v503_v56  ;;  %v519_v60 = vmul.f32 %v503_v56, %v503_v56  ;;  %v528_v61 = vmul.f32 %v506_v57, %v506_v57 }
 0x3f2   :  { %515 = vadd.xlane.f32.xlu1 %v506_v57  ;;  %v527_v62 = vmul.f32 %v505_v58, %v505_v58 }
 0x3f4   :  { %513 = vadd.xlane.f32.xlu0 %v505_v58 }
 0x3f6   :  { %523 = vadd.xlane.f32.xlu1 %v520_v59 }
 0x3f8   :  { %521 = vadd.xlane.f32.xlu0 %v519_v60 }
 0x3fa   :  { %531 = vadd.xlane.f32.xlu1 %v528_v61 }
 0x3fc   :  { %529 = vadd.xlane.f32.xlu0 %v527_v62 }
 0x477   :  { %v510_v63 = vpop.xlane.xlu1 %509 }
 0x478   :  { %v512_v2 = vmul.f32 0.03125, %v510_v63 }
 0x479   :  { %v508_v0 = vpop.xlane.xlu0 %507 }
 0x47a   :  { %v511_v4 = vmul.f32 0.03125, %v508_v0  ;;  %v536_v6 = vmul.f32 %v512_v2, %v512_v2 }
 0x47b   :  { %v516_v1 = vpop.xlane.xlu1 %515 }
 0x47c   :  { %v518_v7 = vmul.f32 0.03125, %v516_v1  ;;  %v535_v10 = vmul.f32 %v511_v4, %v511_v4 }
 0x47d   :  { %v514_v3 = vpop.xlane.xlu0 %513 }
 0x47e   :  { %v517_v11 = vmul.f32 0.03125, %v514_v3  ;;  %v542_v15 = vmul.f32 %v518_v7, %v518_v7  ;;  %v548_v31 = vsel %vm500_vm1, %v512_v2, %v518_v7 }
 0x47f   :  { %v524_v5 = vpop.xlane.xlu1 %523  ;;  %v560_v35 = vsub.f32 %v1022_v52, %v548_v31 }
 0x480   :  { %v526_v8 = vmul.f32 0.03125, %v524_v5  ;;  %v541_v20 = vmul.f32 %v517_v11, %v517_v11  ;;  %v547_v33 = vsel %vm500_vm1, %v511_v4, %v517_v11 }
 0x481   :  { %v522_v9 = vpop.xlane.xlu0 %521  ;;  %v559_v40 = vsub.f32 %v1024_v54, %v547_v33 }
 0x482   :  { %v538_v12 = vsub.f32 %v526_v8, %v536_v6  ;;  %v525_v13 = vmul.f32 0.03125, %v522_v9 }
 0x483   :  { %v532_v14 = vpop.xlane.xlu1 %531 }
 0x484   :  { %v540_v16 = vmax.f32 %v538_v12, 0.0  ;;  %v537_v17 = vsub.f32 %v525_v13, %v535_v10  ;;  %v534_v18 = vmul.f32 0.03125, %v532_v14 }
 0x485   :  { %v530_v19 = vpop.xlane.xlu0 %529 }
 0x486   :  { %v539_v21 = vmax.f32 %v537_v17, 0.0  ;;  %v544_v22 = vsub.f32 %v534_v18, %v542_v15  ;;  %v533_v23 = vmul.f32 0.03125, %v530_v19  ;;  %v550_v24 = vadd.f32 1e-05, %v540_v16 }
 0x488   :  { %v546_v25 = vmax.f32 %v544_v22, 0.0  ;;  %v543_v26 = vsub.f32 %v533_v23, %v541_v20  ;;  %v549_v27 = vadd.f32 1e-05, %v539_v21  ;;  %753 = vrsqrt.f32 %v550_v24 }
 0x48a   :  { %v554_v28 = vadd.f32 1e-05, %v546_v25  ;;  %v545_v29 = vmax.f32 %v543_v26, 0.0 }
 0x48c   :  { %755 = vrsqrt.f32 %v554_v28  ;;  %v553_v30 = vadd.f32 1e-05, %v545_v29 }
 0x48d   :  { %757 = vrsqrt.f32 %v549_v27 }
 0x48e   :  { %759 = vrsqrt.f32 %v553_v30 }
 0x495   :  { %v754_v32 = vpop.eup %753 }
 0x499   :  { %v756_v34 = vpop.eup %755 }
 0x49a   :  { %v758_v36 = vpop.eup %757  ;;  %v558_v38 = vsel %vm500_vm1, %v754_v32, %v756_v34 }
 0x49b   :  { %v760_v39 = vpop.eup %759  ;;  %v562_v41 = vmul.f32 %v560_v35, %v558_v38 }
 0x49c   :  { %v557_v43 = vsel %vm500_vm1, %v758_v36, %v760_v39 }
 0x49d   :  { %v571_v44 = vmul.f32 %v613_v37, %v562_v41  ;;  %v561_v45 = vmul.f32 %v559_v40, %v557_v43 }
 0x49f   :  { %v580_v46 = vadd.f32 %v614_v42, %v571_v44  ;;  %v570_v47 = vmul.f32 %v613_v37, %v561_v45 }
 0x4a1   :  { %v582_v48 = vmax.f32 %v580_v46, -20.0  ;;  %v579_v50 = vadd.f32 %v614_v42, %v570_v47 }
 0x4a3   :  { %v584_v51 = vmin.f32 %v582_v48, 2.0  ;;  %v581_v52 = vmax.f32 %v579_v50, -20.0 }
 0x4a5   :  { %v587_v53 = vmul.f32 1.442695, %v584_v51  ;;  %v583_v55 = vmin.f32 %v581_v52, 2.0 }
 0x4a7   :  { %761 = vpow2.f32 %v587_v53  ;;  %v585_v54 = vmul.f32 1.442695, %v583_v55 }
 0x4a9   :  { %763 = vpow2.f32 %v585_v54 }
 0x4b4   :  { %v762_v56 = vpop.eup %761 }
 0x4b5   :  { %v590_v57 = vmax.f32 %v762_v56, 0.001 }
 0x4b6   :  { %v764_v58 = vpop.eup %763 }
 0x4b7   :  { %v592_v59 = vmin.f32 %v590_v57, 100.0  ;;  %v589_v60 = vmax.f32 %v764_v58, 0.001 }
 0x4b9   :  { %v594_v61 = vsel %vm500_vm1, %v580_v46, %v592_v59  ;;  %v591_v62 = vmin.f32 %v589_v60, 100.0 }
 0x4ba   :  { %596 = vst [vmem:[%s1073_s13 + $0x8] sm:$0xff] %v594_v61 }
 0x4bb   :  { %v593_v63 = vsel %vm500_vm1, %v579_v50, %v591_v62 }
 0x4bc   :  { %595 = vst [vmem:[%s1073_s13] sm:$0xff] %v593_v63 }
 0x4bd   :  { %601 = vsyncpa [#allocation3], 1 }
 0x4be   :  { %602 = vsyncpa [#allocation5], 1 }
 0x4bf   :  { %603 = vsyncpa [#allocation8], 1 }

</bundles_post_ra>
